<compile_context>
chip_gen: v5e
topology: v5e:2x2
jax: 0.10.0
libtpu: 0.0.40
codegen_flags: <defaults>
</compile_context>

<pallas_src>
import jax
import jax.numpy as jnp
import numpy as np
from jax import lax
from jax.experimental import pallas as pl
from jax.experimental.pallas import tpu as pltpu


def critic_kernel(s_ref, a_ref,
                  w1s_ref, w1a_ref, b1_ref,
                  w2_ref, b2_ref,
                  w3_ref, b3_ref,
                  w4_ref,
                  out_ref):
    """Whole 4-layer MLP for one batch tile, entirely in VMEM.

    s_ref:  (tb, S) bf16 state tile;  a_ref: (tb, A) bf16 action tile
    w1s/w1a: W1 split along its input dim (fused concat), bf16
    biases: (1, Hp) f32;  w4_ref: (1, Hp) bf16 final weight row
    out_ref: (1, tb) lane-dense f32 q-value row (before the scalar bias b4)
    """
    # cat([state, action]) @ W1  ==  state @ W1[:S] + action @ W1[S:]
    h = (jnp.dot(s_ref[...], w1s_ref[...], preferred_element_type=jnp.float32)
         + jnp.dot(a_ref[...], w1a_ref[...], preferred_element_type=jnp.float32)
         + b1_ref[...])
    h = jnp.maximum(h, 0.0).astype(jnp.bfloat16)
    h = jnp.dot(h, w2_ref[...], preferred_element_type=jnp.float32) + b2_ref[...]
    h = jnp.maximum(h, 0.0).astype(jnp.bfloat16)
    h = jnp.dot(h, w3_ref[...], preferred_element_type=jnp.float32) + b3_ref[...]
    h = jnp.maximum(h, 0.0).astype(jnp.bfloat16)
    # Final layer: (1, Hp) x (tb, Hp) contracted on Hp (NT dims, like q @ k^T).
    # Avoids an N=1 MXU matmul and directly yields a lane-dense (1, tb) row.
    q_row = lax.dot_general(w4_ref[...], h, (((1,), (1,)), ((), ())),
                            preferred_element_type=jnp.float32)
    out_ref[...] = q_row.astype(out_ref.dtype)


def _round_up(x, m):
    return ((x + m - 1) // m) * m


def _chip_generation():
    """Coarse chip classification for tile caps / VMEM limits / TC count."""
    try:
        kind = jax.devices()[0].device_kind.lower()
    except Exception:
        return "other"
    if "7" in kind:
        return "v7x"
    if "v6" in kind or "6e" in kind:
        return "v6e"
    if "v5" in kind or "5e" in kind:
        return "v5e"
    return "other"


def _choose_batch_tiling(B, gen):
    """Pick (tile_rows, padded_batch).

    Large lane-aligned tiles amortize the ~0.35 us per-grid-step overhead.
    Caps keep padded-lane f32/bf16 buffers + f32 hidden activations inside
    each generation's scoped-VMEM budget.  >=2 steps are only forced on the
    dual-TensorCore v7x; single-TC v5e/v6e take one big tile.
    """
    max_tb = {"v5e": 2048, "v6e": 4096, "v7x": 4096}.get(gen, 1024)
    num_tc = 2 if gen == "v7x" else 1
    Bp = _round_up(B, 128)                       # lane-aligned rows -> dense stores
    steps = pl.cdiv(Bp, max_tb)
    if num_tc == 2 and Bp > 128 * num_tc:
        steps = max(steps, num_tc)               # keep both v7x TCs busy
    tb = _round_up(pl.cdiv(Bp, steps), 128)
    Bp = _round_up(Bp, tb)
    return tb, Bp


def _prepare_params(params, S, A):
    """Split W1 (fused concat), zero-pad hidden dim to a lane multiple,
    cast weights to bf16 (biases stay f32). All padding is mathematically
    exact (padded hidden units are identically zero through every layer)."""
    (w1, b1), (w2, b2), (w3, b3), (w4, b4) = params
    H = w1.shape[1]
    Hp = _round_up(H, 128)
    padH = Hp - H

    def pad_cols(w):
        return jnp.pad(w, ((0, 0), (0, padH))) if padH else w

    def pad_rows_cols(w):
        return jnp.pad(w, ((0, padH), (0, padH))) if padH else w

    w1 = w1.astype(jnp.float32)
    w1s = pad_cols(w1[:S]).astype(jnp.bfloat16)
    w1a = pad_cols(w1[S:S + A]).astype(jnp.bfloat16)
    b1p = pad_cols(b1.reshape(1, H).astype(jnp.float32))
    w2p = pad_rows_cols(w2.astype(jnp.float32)).astype(jnp.bfloat16)
    b2p = pad_cols(b2.reshape(1, H).astype(jnp.float32))
    w3p = pad_rows_cols(w3.astype(jnp.float32)).astype(jnp.bfloat16)
    b3p = pad_cols(b3.reshape(1, H).astype(jnp.float32))
    w4p = pad_cols(w4.reshape(1, H).astype(jnp.float32)).astype(jnp.bfloat16)
    b4s = jnp.asarray(b4, jnp.float32).reshape(())
    return (w1s, w1a, b1p, w2p, b2p, w3p, b3p, w4p, b4s), Hp


def _critic_forward(state, action, params):
    """Pallas-backed Critic.forward. state: (B, S), action: (B, A) -> (B, 1)."""
    B, S = state.shape
    _, A = action.shape
    (w1s, w1a, b1, w2, b2, w3, b3, w4_row, b4), Hp = _prepare_params(params, S, A)

    gen = _chip_generation()
    tb, Bp = _choose_batch_tiling(B, gen)

    state_bf = state.astype(jnp.bfloat16)
    action_bf = action.astype(jnp.bfloat16)
    if Bp != B:
        state_bf = jnp.pad(state_bf, ((0, Bp - B), (0, 0)))
        action_bf = jnp.pad(action_bf, ((0, Bp - B), (0, 0)))

    grid = (Bp // tb,)

    def resident(i):  # weights/biases stay resident across the batch grid
        return (0, 0)

    # Advisory cost so XLA schedules neighbouring ops around this kernel.
    flops = 2 * Bp * (S + A) * Hp + 4 * Bp * Hp * Hp + 2 * Bp * Hp
    bytes_accessed = (Bp * (S + A) * 2 + Bp * 4               # inputs + output
                      + ((S + A) * Hp + 2 * Hp * Hp + Hp) * 2  # bf16 weights
                      + 3 * Hp * 4)                            # f32 biases

    cp_kwargs = dict(dimension_semantics=("parallel",))
    if gen in ("v5e", "v6e"):
        # 128 MiB physical VMEM on these parts; lift the 16/32 MiB scoped
        # default so the large batch tiles never hit it.
        cp_kwargs["vmem_limit_bytes"] = 64 << 20

    out_row = pl.pallas_call(
        critic_kernel,
        out_shape=jax.ShapeDtypeStruct((1, Bp), jnp.float32),
        grid_spec=pltpu.PrefetchScalarGridSpec(
            num_scalar_prefetch=0,
            grid=grid,
            in_specs=[
                pl.BlockSpec((tb, S), lambda i: (i, 0)),   # state tile
                pl.BlockSpec((tb, A), lambda i: (i, 0)),   # action tile
                pl.BlockSpec((S, Hp), resident),           # W1[:S]
                pl.BlockSpec((A, Hp), resident),           # W1[S:]
                pl.BlockSpec((1, Hp), resident),           # b1
                pl.BlockSpec((Hp, Hp), resident),          # W2
                pl.BlockSpec((1, Hp), resident),           # b2
                pl.BlockSpec((Hp, Hp), resident),          # W3
                pl.BlockSpec((1, Hp), resident),           # b3
                pl.BlockSpec((1, Hp), resident),           # W4 (row)
            ],
            out_specs=pl.BlockSpec((1, tb), lambda i: (0, i)),  # lane-dense row
        ),
        compiler_params=pltpu.CompilerParams(**cp_kwargs),
        cost_estimate=pl.CostEstimate(flops=flops, transcendentals=0,
                                      bytes_accessed=bytes_accessed),
    )(state_bf, action_bf, w1s, w1a, b1, w2, b2, w3, b3, w4_row)

    # Slice off batch padding, lay out as (B, 1), add the scalar final bias.
    return out_row[:, :B].reshape(B, 1) + b4


critic_forward = jax.jit(_critic_forward)


def init_linear(key, fan_in, fan_out):
    """PyTorch nn.Linear default init: U(-1/sqrt(fan_in), 1/sqrt(fan_in))."""
    kw, kb = jax.random.split(key)
    bound = 1.0 / np.sqrt(fan_in)
    w = jax.random.uniform(kw, (fan_in, fan_out), jnp.float32, -bound, bound)
    b = jax.random.uniform(kb, (1, fan_out), jnp.float32, -bound, bound)
    return w, b


def reference_forward(state, action, params):
    x = jnp.concatenate([state, action], axis=-1).astype(jnp.float32)
    (w1, b1), (w2, b2), (w3, b3), (w4, b4) = params
    h = jnp.maximum(x @ w1 + b1, 0.0)
    h = jnp.maximum(h @ w2 + b2, 0.0)
    h = jnp.maximum(h @ w3 + b3, 0.0)
    return h @ w4 + b4


if __name__ == "__main__":
    key = jax.random.PRNGKey(0)
    state_dim, action_dim, hidden_dim = 17, 6, 32

    k_s, k_a, k1, k2, k3, k4, k_s2, k_a2 = jax.random.split(key, 8)
    params = (
        init_linear(k1, state_dim + action_dim, hidden_dim),
        init_linear(k2, hidden_dim, hidden_dim),
        init_linear(k3, hidden_dim, hidden_dim),
        init_linear(k4, hidden_dim, 1),
    )

    # bf16 inputs/weights -> relaxed tolerance vs. the f32 reference.
    rtol, atol = 5e-2, 5e-2

    # Small-batch check (single 128-row padded tile).
    batch = 16
    state = jax.random.normal(k_s, (batch, state_dim), jnp.float32)
    action = jax.random.normal(k_a, (batch, action_dim), jnp.float32)
    q = jax.block_until_ready(critic_forward(state, action, params))
    q_ref = reference_forward(state, action, params)
    assert q.shape == (batch, 1)
    np.testing.assert_allclose(np.asarray(q), np.asarray(q_ref),
                               rtol=rtol, atol=atol)

    # Ragged batch: exercises batch padding + output slicing.
    batch2 = 200
    state2 = jax.random.normal(k_s2, (batch2, state_dim), jnp.float32)
    action2 = jax.random.normal(k_a2, (batch2, action_dim), jnp.float32)
    q2 = jax.block_until_ready(critic_forward(state2, action2, params))
    q2_ref = reference_forward(state2, action2, params)
    assert q2.shape == (batch2, 1)
    np.testing.assert_allclose(np.asarray(q2), np.asarray(q2_ref),
                               rtol=rtol, atol=atol)

    print("KERNEL_OK")
</pallas_src>

<mosaic_0001>
module attributes {stable_mosaic.version = 11 : i64} {
  func.func @critic_kernel(%arg0: i32, %arg1: memref<128x17xbf16, #tpu.memory_space<vmem>>, %arg2: memref<128x6xbf16, #tpu.memory_space<vmem>>, %arg3: memref<17x128xbf16, #tpu.memory_space<vmem>>, %arg4: memref<6x128xbf16, #tpu.memory_space<vmem>>, %arg5: memref<1x128xf32, #tpu.memory_space<vmem>>, %arg6: memref<128x128xbf16, #tpu.memory_space<vmem>>, %arg7: memref<1x128xf32, #tpu.memory_space<vmem>>, %arg8: memref<128x128xbf16, #tpu.memory_space<vmem>>, %arg9: memref<1x128xf32, #tpu.memory_space<vmem>>, %arg10: memref<1x128xbf16, #tpu.memory_space<vmem>>, %arg11: memref<1x128xf32, #tpu.memory_space<vmem>>) attributes {dimension_semantics = [#tpu.dimension_semantics<parallel>], iteration_bounds = array<i64: 1>, scalar_prefetch = 0 : i64, scratch_operands = 0 : i64, tpu.core_type = #tpu.core_type<tc>, window_params = [{transform_indices = @transform_0, window_bounds = array<i64: 128, 17>}, {transform_indices = @transform_1, window_bounds = array<i64: 128, 6>}, {pipeline_mode = #tpu.pipeline_mode<synchronous>, transform_indices = @transform_2, window_bounds = array<i64: 17, 128>}, {pipeline_mode = #tpu.pipeline_mode<synchronous>, transform_indices = @transform_3, window_bounds = array<i64: 6, 128>}, {pipeline_mode = #tpu.pipeline_mode<synchronous>, transform_indices = @transform_4, window_bounds = array<i64: 1, 128>}, {pipeline_mode = #tpu.pipeline_mode<synchronous>, transform_indices = @transform_5, window_bounds = array<i64: 128, 128>}, {pipeline_mode = #tpu.pipeline_mode<synchronous>, transform_indices = @transform_6, window_bounds = array<i64: 1, 128>}, {pipeline_mode = #tpu.pipeline_mode<synchronous>, transform_indices = @transform_7, window_bounds = array<i64: 128, 128>}, {pipeline_mode = #tpu.pipeline_mode<synchronous>, transform_indices = @transform_8, window_bounds = array<i64: 1, 128>}, {pipeline_mode = #tpu.pipeline_mode<synchronous>, transform_indices = @transform_9, window_bounds = array<i64: 1, 128>}, {transform_indices = @transform_10, window_bounds = array<i64: 1, 128>}]} {
    %c0 = arith.constant 0 : index
    %c0_0 = arith.constant 0 : index
    %0 = vector.load %arg1[%c0, %c0_0] : memref<128x17xbf16, #tpu.memory_space<vmem>>, vector<128x17xbf16>
    %c0_1 = arith.constant 0 : index
    %c0_2 = arith.constant 0 : index
    %1 = vector.load %arg3[%c0_1, %c0_2] : memref<17x128xbf16, #tpu.memory_space<vmem>>, vector<17x128xbf16>
    %cst = arith.constant dense<0.000000e+00> : vector<128x128xf32>
    %2 = tpu.matmul %0, %1, %cst {dimension_numbers = #tpu.dot_dimension_numbers<[1], [0], [0], [1], [0, 0, 1, 1], [], []>} : vector<128x17xbf16>, vector<17x128xbf16>, vector<128x128xf32> -> vector<128x128xf32>
    %c0_3 = arith.constant 0 : index
    %c0_4 = arith.constant 0 : index
    %3 = vector.load %arg2[%c0_3, %c0_4] : memref<128x6xbf16, #tpu.memory_space<vmem>>, vector<128x6xbf16>
    %c0_5 = arith.constant 0 : index
    %c0_6 = arith.constant 0 : index
    %4 = vector.load %arg4[%c0_5, %c0_6] : memref<6x128xbf16, #tpu.memory_space<vmem>>, vector<6x128xbf16>
    %cst_7 = arith.constant dense<0.000000e+00> : vector<128x128xf32>
    %5 = tpu.matmul %3, %4, %cst_7 {dimension_numbers = #tpu.dot_dimension_numbers<[1], [0], [0], [1], [0, 0, 1, 1], [], []>} : vector<128x6xbf16>, vector<6x128xbf16>, vector<128x128xf32> -> vector<128x128xf32>
    %6 = arith.addf %2, %5 : vector<128x128xf32>
    %c0_8 = arith.constant 0 : index
    %c0_9 = arith.constant 0 : index
    %7 = vector.load %arg5[%c0_8, %c0_9] : memref<1x128xf32, #tpu.memory_space<vmem>>, vector<1x128xf32>
    %8 = vector.broadcast %7 : vector<1x128xf32> to vector<128x128xf32>
    %9 = arith.addf %6, %8 : vector<128x128xf32>
    %cst_10 = arith.constant 0.000000e+00 : f32
    %10 = vector.broadcast %cst_10 : f32 to vector<128x128xf32>
    %11 = arith.maximumf %9, %10 : vector<128x128xf32>
    %12 = arith.truncf %11 : vector<128x128xf32> to vector<128x128xbf16>
    %c0_11 = arith.constant 0 : index
    %c0_12 = arith.constant 0 : index
    %13 = vector.load %arg6[%c0_11, %c0_12] : memref<128x128xbf16, #tpu.memory_space<vmem>>, vector<128x128xbf16>
    %cst_13 = arith.constant dense<0.000000e+00> : vector<128x128xf32>
    %14 = tpu.matmul %12, %13, %cst_13 {dimension_numbers = #tpu.dot_dimension_numbers<[1], [0], [0], [1], [0, 0, 1, 1], [], []>} : vector<128x128xbf16>, vector<128x128xbf16>, vector<128x128xf32> -> vector<128x128xf32>
    %c0_14 = arith.constant 0 : index
    %c0_15 = arith.constant 0 : index
    %15 = vector.load %arg7[%c0_14, %c0_15] : memref<1x128xf32, #tpu.memory_space<vmem>>, vector<1x128xf32>
    %16 = vector.broadcast %15 : vector<1x128xf32> to vector<128x128xf32>
    %17 = arith.addf %14, %16 : vector<128x128xf32>
    %cst_16 = arith.constant 0.000000e+00 : f32
    %18 = vector.broadcast %cst_16 : f32 to vector<128x128xf32>
    %19 = arith.maximumf %17, %18 : vector<128x128xf32>
    %20 = arith.truncf %19 : vector<128x128xf32> to vector<128x128xbf16>
    %c0_17 = arith.constant 0 : index
    %c0_18 = arith.constant 0 : index
    %21 = vector.load %arg8[%c0_17, %c0_18] : memref<128x128xbf16, #tpu.memory_space<vmem>>, vector<128x128xbf16>
    %cst_19 = arith.constant dense<0.000000e+00> : vector<128x128xf32>
    %22 = tpu.matmul %20, %21, %cst_19 {dimension_numbers = #tpu.dot_dimension_numbers<[1], [0], [0], [1], [0, 0, 1, 1], [], []>} : vector<128x128xbf16>, vector<128x128xbf16>, vector<128x128xf32> -> vector<128x128xf32>
    %c0_20 = arith.constant 0 : index
    %c0_21 = arith.constant 0 : index
    %23 = vector.load %arg9[%c0_20, %c0_21] : memref<1x128xf32, #tpu.memory_space<vmem>>, vector<1x128xf32>
    %24 = vector.broadcast %23 : vector<1x128xf32> to vector<128x128xf32>
    %25 = arith.addf %22, %24 : vector<128x128xf32>
    %cst_22 = arith.constant 0.000000e+00 : f32
    %26 = vector.broadcast %cst_22 : f32 to vector<128x128xf32>
    %27 = arith.maximumf %25, %26 : vector<128x128xf32>
    %28 = arith.truncf %27 : vector<128x128xf32> to vector<128x128xbf16>
    %c0_23 = arith.constant 0 : index
    %c0_24 = arith.constant 0 : index
    %29 = vector.load %arg10[%c0_23, %c0_24] : memref<1x128xbf16, #tpu.memory_space<vmem>>, vector<1x128xbf16>
    %cst_25 = arith.constant dense<0.000000e+00> : vector<1x128xf32>
    %30 = tpu.matmul %29, %28, %cst_25 {dimension_numbers = #tpu.dot_dimension_numbers<[1], [1], [0], [0], [0, 0, 1, 0], [], []>} : vector<1x128xbf16>, vector<128x128xbf16>, vector<1x128xf32> -> vector<1x128xf32>
    %c0_26 = arith.constant 0 : index
    %c0_27 = arith.constant 0 : index
    %31 = vector.load %arg11[%c0_26, %c0_27] : memref<1x128xf32, #tpu.memory_space<vmem>>, vector<1x128xf32>
    tpu.vector_store %arg11[%c0_26, %c0_27], %30 {strides = array<i32>} : memref<1x128xf32, #tpu.memory_space<vmem>>, vector<1x128xf32>,
    return
  }
  func.func @transform_0(%arg0: i32) -> (i32, i32) {
    %c0_i32 = arith.constant 0 : i32
    %c0_i32_0 = arith.constant 0 : i32
    return %arg0, %c0_i32 : i32, i32
  }
  func.func @transform_1(%arg0: i32) -> (i32, i32) {
    %c0_i32 = arith.constant 0 : i32
    %c0_i32_0 = arith.constant 0 : i32
    return %arg0, %c0_i32 : i32, i32
  }
  func.func @transform_2(%arg0: i32) -> (i32, i32) {
    %c0_i32 = arith.constant 0 : i32
    %c0_i32_0 = arith.constant 0 : i32
    %c0_i32_1 = arith.constant 0 : i32
    return %c0_i32, %c0_i32_0 : i32, i32
  }
  func.func @transform_3(%arg0: i32) -> (i32, i32) {
    %c0_i32 = arith.constant 0 : i32
    %c0_i32_0 = arith.constant 0 : i32
    %c0_i32_1 = arith.constant 0 : i32
    return %c0_i32, %c0_i32_0 : i32, i32
  }
  func.func @transform_4(%arg0: i32) -> (i32, i32) {
    %c0_i32 = arith.constant 0 : i32
    %c0_i32_0 = arith.constant 0 : i32
    %c0_i32_1 = arith.constant 0 : i32
    return %c0_i32, %c0_i32_0 : i32, i32
  }
  func.func @transform_5(%arg0: i32) -> (i32, i32) {
    %c0_i32 = arith.constant 0 : i32
    %c0_i32_0 = arith.constant 0 : i32
    %c0_i32_1 = arith.constant 0 : i32
    return %c0_i32, %c0_i32_0 : i32, i32
  }
  func.func @transform_6(%arg0: i32) -> (i32, i32) {
    %c0_i32 = arith.constant 0 : i32
    %c0_i32_0 = arith.constant 0 : i32
    %c0_i32_1 = arith.constant 0 : i32
    return %c0_i32, %c0_i32_0 : i32, i32
  }
  func.func @transform_7(%arg0: i32) -> (i32, i32) {
    %c0_i32 = arith.constant 0 : i32
    %c0_i32_0 = arith.constant 0 : i32
    %c0_i32_1 = arith.constant 0 : i32
    return %c0_i32, %c0_i32_0 : i32, i32
  }
  func.func @transform_8(%arg0: i32) -> (i32, i32) {
    %c0_i32 = arith.constant 0 : i32
    %c0_i32_0 = arith.constant 0 : i32
    %c0_i32_1 = arith.constant 0 : i32
    return %c0_i32, %c0_i32_0 : i32, i32
  }
  func.func @transform_9(%arg0: i32) -> (i32, i32) {
    %c0_i32 = arith.constant 0 : i32
    %c0_i32_0 = arith.constant 0 : i32
    %c0_i32_1 = arith.constant 0 : i32
    return %c0_i32, %c0_i32_0 : i32, i32
  }
  func.func @transform_10(%arg0: i32) -> (i32, i32) {
    %c0_i32 = arith.constant 0 : i32
    %c0_i32_0 = arith.constant 0 : i32
    return %c0_i32, %arg0 : i32, i32
  }
}

</mosaic_0001>

<bundles_post_ra>
// kernel: _critic_forward.1
= control target key start
LH: loop header
LB: loop body
LE: loop exit
PB: predicated region body
PF: predicated region fallthrough
CT: control target
= control target key end

     0   :  { %vm137_vm0 = vcmask 1042432   ;;  %vm264_vm1 = vcmask 1040384   ;;  %vm112_vm2 = vcmask 48128   ;;  %v849_v5 = vmov 0   ;;  %s1059_s3 = inlined_call_operand.vmem [shape: bf16[6,128], index: 3, kind: input, shape index: {}]   ;;  %s1060_s1 = inlined_call_operand.vmem [shape: bf16[128,6], index: 1, kind: input, shape index: {}]   ;;  %s1061_s2 = inlined_call_operand.vmem [shape: bf16[17,128], index: 2, kind: input, shape index: {}]   ;;  %s1062_s0 = inlined_call_operand.vmem [shape: bf16[128,17], index: 0, kind: input, shape index: {}]   ;;  %s1063_s4 = inlined_call_operand.vmem [shape: f32[1,128], index: 4, kind: input, shape index: {}]   ;;  %s1064_s5 = inlined_call_operand.vmem [shape: bf16[128,128], index: 5, kind: input, shape index: {}]   ;;  %s1065_s6 = inlined_call_operand.vmem [shape: f32[1,128], index: 6, kind: input, shape index: {}]   ;;  %s1066_s7 = inlined_call_operand.vmem [shape: bf16[128,128], index: 7, kind: input, shape index: {}]   ;;  %s1067_s8 = inlined_call_operand.vmem [shape: f32[1,128], index: 8, kind: input, shape index: {}]   ;;  %s1068_s9 = inlined_call_operand.vmem [shape: bf16[1,128], index: 9, kind: input, shape index: {}]   ;;  %s1069_s10 = inlined_call_operand.vmem [shape: f32[1,128], index: 10, kind: output, shape index: {}]  }
   0x1   :  { %v71_v0 = vld [vmem:[%s1059_s3] sm:$0x7]  ;;  %v54_v1 = vld [vmem:[%s1061_s2 + $0x8] sm:$0x1]  ;;  %v266_v6 = vsel %vm264_vm1, 65535, %v849_v5  ;;  %vm239_vm3 = vcmask 138240  }
   0x2   :  { %v139_v2 = vsel %vm137_vm0, %v71_v0, 0  ;;  %v821_v3 = vld [vmem:[%s1060_s1] sm:$0xff]  ;;  %v235_v4 = vunpack.c.l.b16 %v54_v1  ;;  %v822_v11 = vld [vmem:[%s1060_s1 + $0x8] sm:$0xff]  ;;  %v823_v13 = vld [vmem:[%s1060_s1 + $0x10] sm:$0xff] }
   0x3   :  { %148 = vmatpush.bf16.msra.mxu0 %v139_v2  ;;  %v820_v9 = vld [vmem:[%s1061_s2] sm:$0xff]  ;;  %v813_v12 = vld [vmem:[%s1062_s0 + $0x8] sm:$0xff]  ;;  %v814_v14 = vld [vmem:[%s1062_s0 + $0x10] sm:$0xff] }
   0x4   :  { %v237_v7 = vpack.c.b16 %v235_v4, %v235_v4  ;;  %v812_v10 = vld [vmem:[%s1062_s0] sm:$0xff]  ;;  %v824_v15 = vld [vmem:[%s1060_s1 + $0x18] sm:$0xff]  ;;  %v826_v19 = vld [vmem:[%s1060_s1 + $0x28] sm:$0xff] }
   0x5   :  { %v815_v16 = vld [vmem:[%s1062_s0 + $0x18] sm:$0xff]  ;;  %v825_v17 = vld [vmem:[%s1060_s1 + $0x20] sm:$0xff]  ;;  %v817_v21 = vld [vmem:[%s1062_s0 + $0x28] sm:$0xff] }
   0x6   :  { %696 = vmatmul.msk.bf16.vlgmr.msra.gmra.mxu0 %vm112_vm2, %v821_v3  ;;  %v268_v8 = vand.u32 %v266_v6, %v237_v7  ;;  %v816_v18 = vld [vmem:[%s1062_s0 + $0x20] sm:$0xff]  ;;  %v836_v20 = vld [vmem:[%s1064_s5 + $0x38] sm:$0xff]  ;;  %v835_v22 = vld [vmem:[%s1064_s5 + $0x30] sm:$0xff] }
   0x7   :  { %431 = vmatpush.bf16.msra.mxu2 %v836_v20  ;;  %v827_v23 = vld [vmem:[%s1060_s1 + $0x30] sm:$0xff]  ;;  %v834_v24 = vld [vmem:[%s1064_s5 + $0x28] sm:$0xff]  ;;  %v833_v25 = vld [vmem:[%s1064_s5 + $0x20] sm:$0xff] }
   0x8   :  { %276 = vmatpush.bf16.msra.mxu1 %v268_v8  ;;  %v818_v26 = vld [vmem:[%s1062_s0 + $0x30] sm:$0xff]  ;;  %v832_v27 = vld [vmem:[%s1064_s5 + $0x18] sm:$0xff]  ;;  %v830_v30 = vld [vmem:[%s1064_s5 + $0x8] sm:$0xff] }
   0x9   :  { %v831_v28 = vld [vmem:[%s1064_s5 + $0x10] sm:$0xff]  ;;  %v828_v29 = vld [vmem:[%s1060_s1 + $0x38] sm:$0xff]  ;;  %v829_v31 = vld [vmem:[%s1064_s5] sm:$0xff] }
   0xa   :  { %v819_v32 = vld [vmem:[%s1062_s0 + $0x38] sm:$0xff]  ;;  %v1005_v37 = vld [vmem:[%s1063_s4] ss:$0 sm:$0xff] }
   0xb   :  { %432 = vmatpush.bf16.msra.mxu2 %v835_v22 }
   0xc   :  { %277 = vmatpush.bf16.msra.mxu1 %v820_v9 }
   0xf   :  { %740 = vmatmul.msk.bf16.vlgmr.msra.gmra.mxu1 %vm239_vm3, %v812_v10  ;;  %433 = vmatpush.bf16.msra.mxu2 %v834_v24 }
  0x13   :  { %434 = vmatpush.bf16.msra.mxu2 %v833_v25 }
  0x16   :  { %697 = vmatmul.msk.bf16.gmra.mxu0 %vm112_vm2, %v822_v11 }
  0x17   :  { %435 = vmatpush.bf16.msra.mxu2 %v832_v27 }
  0x1b   :  { %436 = vmatpush.bf16.msra.mxu2 %v831_v28 }
  0x1f   :  { %741 = vmatmul.msk.bf16.gmra.mxu1 %vm239_vm3, %v813_v12  ;;  %437 = vmatpush.bf16.msra.mxu2 %v830_v30 }
  0x23   :  { %438 = vmatpush.bf16.msra.mxu2 %v829_v31 }
  0x26   :  { %698 = vmatmul.msk.bf16.gmra.mxu0 %vm112_vm2, %v823_v13 }
  0x2f   :  { %742 = vmatmul.msk.bf16.gmra.mxu1 %vm239_vm3, %v814_v14 }
  0x36   :  { %699 = vmatmul.msk.bf16.gmra.mxu0 %vm112_vm2, %v824_v15 }
  0x3f   :  { %743 = vmatmul.msk.bf16.gmra.mxu1 %vm239_vm3, %v815_v16 }
  0x46   :  { %700 = vmatmul.msk.bf16.gmra.mxu0 %vm112_vm2, %v825_v17 }
  0x4f   :  { %744 = vmatmul.msk.bf16.gmra.mxu1 %vm239_vm3, %v816_v18 }
  0x56   :  { %701 = vmatmul.msk.bf16.gmra.mxu0 %vm112_vm2, %v826_v19 }
  0x5f   :  { %745 = vmatmul.msk.bf16.gmra.mxu1 %vm239_vm3, %v817_v21 }
  0x66   :  { %702 = vmatmul.msk.bf16.gmra.mxu0 %vm112_vm2, %v827_v23 }
  0x6f   :  { %746 = vmatmul.msk.bf16.gmra.mxu1 %vm239_vm3, %v818_v26 }
  0x76   :  { %703 = vmatmul.msk.bf16.gmra.mxu0 %vm112_vm2, %v828_v29 }
  0x7f   :  { %747 = vmatmul.msk.bf16.gmra.mxu1 %vm239_vm3, %v819_v32 }
  0x83   :  { %v150_v33 = vpop.f32.mrf.mxu0 }
  0x8b   :  { %v152_v34 = vpop.f32.mrf.mxu0 }
  0x8c   :  { %v279_v35 = vpop.f32.mrf.mxu1 }
  0x8d   :  { %v280_v36 = vadd.f32 %v279_v35, %v150_v33 }
  0x8f   :  { %v323_v40 = vadd.f32 %v1005_v37, %v280_v36 }
  0x91   :  { %v339_v43 = vmax.f32 %v323_v40, 0.0  ;;  %v843_v40 = vld [vmem:[%s1066_s7 + $0x30] sm:$0xff] }
  0x93   :  { %v155_v38 = vpop.f32.mrf.mxu0 }
  0x94   :  { %v281_v39 = vpop.f32.mrf.mxu1 }
  0x95   :  { %v282_v41 = vadd.f32 %v281_v39, %v152_v34  ;;  %v844_v39 = vld [vmem:[%s1066_s7 + $0x38] sm:$0xff] }
  0x96   :  { %572 = vmatpush.bf16.msra.mxu3 %v844_v39 }
  0x97   :  { %v324_v42 = vadd.f32 %v1005_v37, %v282_v41 }
  0x99   :  { %v340_v44 = vmax.f32 %v324_v42, 0.0 }
  0x9a   :  { %573 = vmatpush.bf16.msra.mxu3 %v843_v40 }
  0x9b   :  { %v157_v45 = vpop.f32.mrf.mxu0  ;;  %v355_v46 = vpack.c.bf16 %v340_v44, %v339_v43  ;;  %v842_v43 = vld [vmem:[%s1066_s7 + $0x28] sm:$0xff] }
  0x9c   :  { %v284_v47 = vpop.f32.mrf.mxu1 }
  0x9d   :  { %439 = vmatmul.bf16.vlgmr.msra.gmra.mxu2 %v355_v46  ;;  %v285_v48 = vadd.f32 %v284_v47, %v155_v38 }
  0x9e   :  { %574 = vmatpush.bf16.msra.mxu3 %v842_v43 }
  0x9f   :  { %v325_v51 = vadd.f32 %v1005_v37, %v285_v48  ;;  %v841_v48 = vld [vmem:[%s1066_s7 + $0x20] sm:$0xff] }
  0xa1   :  { %v341_v54 = vmax.f32 %v325_v51, 0.0 }
  0xa2   :  { %575 = vmatpush.bf16.msra.mxu3 %v841_v48 }
  0xa3   :  { %v160_v49 = vpop.f32.mrf.mxu0 }
  0xa4   :  { %v286_v50 = vpop.f32.mrf.mxu1 }
  0xa5   :  { %v287_v52 = vadd.f32 %v286_v50, %v157_v45 }
  0xa7   :  { %v326_v53 = vadd.f32 %v1005_v37, %v287_v52 }
  0xa9   :  { %v342_v55 = vmax.f32 %v326_v53, 0.0 }
  0xab   :  { %v162_v56 = vpop.f32.mrf.mxu0  ;;  %v356_v57 = vpack.c.bf16 %v342_v55, %v341_v54  ;;  %v840_v54 = vld [vmem:[%s1066_s7 + $0x18] sm:$0xff] }
  0xac   :  { %v289_v58 = vpop.f32.mrf.mxu1  ;;  %576 = vmatpush.bf16.msra.mxu3 %v840_v54 }
  0xad   :  { %444 = vmatmul.bf16.gmra.mxu2 %v356_v57  ;;  %v290_v59 = vadd.f32 %v289_v58, %v160_v49 }
  0xaf   :  { %v327_v62 = vadd.f32 %v1005_v37, %v290_v59 }
  0xb1   :  { %v343_v1 = vmax.f32 %v327_v62, 0.0 }
  0xb3   :  { %v165_v60 = vpop.f32.mrf.mxu0 }
  0xb4   :  { %v291_v61 = vpop.f32.mrf.mxu1 }
  0xb5   :  { %v292_v63 = vadd.f32 %v291_v61, %v162_v56  ;;  %v839_v56 = vld [vmem:[%s1066_s7 + $0x10] sm:$0xff]  ;;  %v838_v61 = vld [vmem:[%s1066_s7 + $0x8] sm:$0xff] }
  0xb6   :  { %577 = vmatpush.bf16.msra.mxu3 %v839_v56 }
  0xb7   :  { %v328_v0 = vadd.f32 %v1005_v37, %v292_v63 }
  0xb9   :  { %v344_v2 = vmax.f32 %v328_v0, 0.0 }
  0xba   :  { %578 = vmatpush.bf16.msra.mxu3 %v838_v61  ;;  %v848_v61 = vld [vmem:[%s1067_s8] ss:$0 sm:$0xff] }
  0xbb   :  { %v167_v3 = vpop.f32.mrf.mxu0  ;;  %v357_v4 = vpack.c.bf16 %v344_v2, %v343_v1  ;;  %v837_v1 = vld [vmem:[%s1066_s7] sm:$0xff] }
  0xbc   :  { %v294_v5 = vpop.f32.mrf.mxu1 }
  0xbd   :  { %449 = vmatmul.bf16.gmra.mxu2 %v357_v4  ;;  %v295_v6 = vadd.f32 %v294_v5, %v165_v60  ;;  %v847_v4 = vld [vmem:[%s1065_s6] ss:$0 sm:$0xff] }
  0xbe   :  { %579 = vmatpush.bf16.msra.mxu3 %v837_v1 }
  0xbf   :  { %v329_v9 = vadd.f32 %v1005_v37, %v295_v6 }
  0xc1   :  { %v345_v12 = vmax.f32 %v329_v9, 0.0 }
  0xc3   :  { %v170_v7 = vpop.f32.mrf.mxu0 }
  0xc4   :  { %v296_v8 = vpop.f32.mrf.mxu1 }
  0xc5   :  { %v297_v10 = vadd.f32 %v296_v8, %v167_v3 }
  0xc7   :  { %v330_v11 = vadd.f32 %v1005_v37, %v297_v10 }
  0xc9   :  { %v346_v13 = vmax.f32 %v330_v11, 0.0 }
  0xcb   :  { %v172_v14 = vpop.f32.mrf.mxu0  ;;  %v358_v15 = vpack.c.bf16 %v346_v13, %v345_v12 }
  0xcc   :  { %v299_v16 = vpop.f32.mrf.mxu1 }
  0xcd   :  { %454 = vmatmul.bf16.gmra.mxu2 %v358_v15  ;;  %v300_v17 = vadd.f32 %v299_v16, %v170_v7 }
  0xcf   :  { %v331_v20 = vadd.f32 %v1005_v37, %v300_v17 }
  0xd1   :  { %v347_v23 = vmax.f32 %v331_v20, 0.0 }
  0xd3   :  { %v175_v18 = vpop.f32.mrf.mxu0 }
  0xd4   :  { %v301_v19 = vpop.f32.mrf.mxu1 }
  0xd5   :  { %v302_v21 = vadd.f32 %v301_v19, %v172_v14 }
  0xd7   :  { %v332_v22 = vadd.f32 %v1005_v37, %v302_v21 }
  0xd9   :  { %v348_v24 = vmax.f32 %v332_v22, 0.0 }
  0xdb   :  { %v359_v25 = vpack.c.bf16 %v348_v24, %v347_v23  ;;  %v177_v26 = vpop.f32.mrf.mxu0 }
  0xdc   :  { %v304_v27 = vpop.f32.mrf.mxu1 }
  0xdd   :  { %459 = vmatmul.bf16.gmra.mxu2 %v359_v25  ;;  %v305_v28 = vadd.f32 %v304_v27, %v175_v18 }
  0xdf   :  { %v333_v30 = vadd.f32 %v1005_v37, %v305_v28 }
  0xe1   :  { %v349_v34 = vmax.f32 %v333_v30, 0.0 }
  0xe3   :  { %v180_v32 = vpop.f32.mrf.mxu0 }
  0xe4   :  { %v306_v29 = vpop.f32.mrf.mxu1 }
  0xe5   :  { %v307_v31 = vadd.f32 %v306_v29, %v177_v26 }
  0xe7   :  { %v334_v33 = vadd.f32 %v1005_v37, %v307_v31 }
  0xe9   :  { %v350_v35 = vmax.f32 %v334_v33, 0.0 }
  0xeb   :  { %v360_v36 = vpack.c.bf16 %v350_v35, %v349_v34  ;;  %v182_v41 = vpop.f32.mrf.mxu0 }
  0xec   :  { %v309_v38 = vpop.f32.mrf.mxu1 }
  0xed   :  { %464 = vmatmul.bf16.gmra.mxu2 %v360_v36  ;;  %v310_v42 = vadd.f32 %v309_v38, %v180_v32 }
  0xef   :  { %v335_v45 = vadd.f32 %v1005_v37, %v310_v42 }
  0xf1   :  { %v351_v49 = vmax.f32 %v335_v45, 0.0 }
  0xf3   :  { %v185_v51 = vpop.f32.mrf.mxu0 }
  0xf4   :  { %v311_v44 = vpop.f32.mrf.mxu1 }
  0xf5   :  { %v312_v46 = vadd.f32 %v311_v44, %v182_v41 }
  0xf7   :  { %v336_v47 = vadd.f32 %v1005_v37, %v312_v46 }
  0xf9   :  { %v352_v50 = vmax.f32 %v336_v47, 0.0 }
  0xfb   :  { %v361_v52 = vpack.c.bf16 %v352_v50, %v351_v49  ;;  %v187_v57 = vpop.f32.mrf.mxu0 }
  0xfc   :  { %v314_v53 = vpop.f32.mrf.mxu1 }
  0xfd   :  { %469 = vmatmul.bf16.gmra.mxu2 %v361_v52  ;;  %v315_v55 = vadd.f32 %v314_v53, %v185_v51 }
  0xff   :  { %v337_v59 = vadd.f32 %v1005_v37, %v315_v55 }
 0x101   :  { %v353_v63 = vmax.f32 %v337_v59, 0.0 }
 0x104   :  { %v316_v58 = vpop.f32.mrf.mxu1 }
 0x105   :  { %v317_v60 = vadd.f32 %v316_v58, %v187_v57 }
 0x107   :  { %v338_v62 = vadd.f32 %v1005_v37, %v317_v60 }
 0x109   :  { %v354_v0 = vmax.f32 %v338_v62, 0.0 }
 0x10b   :  { %v362_v2 = vpack.c.bf16 %v354_v0, %v353_v63 }
 0x10d   :  { %474 = vmatmul.bf16.gmra.mxu2 %v362_v2 }
 0x120   :  { %v440_v3 = vpop.f32.mrf.mxu2 }
 0x121   :  { %v441_v5 = vadd.f32 %v847_v4, %v440_v3 }
 0x123   :  { %v480_v8 = vmax.f32 %v441_v5, 0.0 }
 0x128   :  { %v442_v6 = vpop.f32.mrf.mxu2 }
 0x129   :  { %v443_v7 = vadd.f32 %v847_v4, %v442_v6 }
 0x12b   :  { %v481_v37 = vmax.f32 %v443_v7, 0.0 }
 0x12d   :  { %v496_v9 = vpack.c.bf16 %v481_v37, %v480_v8 }
 0x12f   :  { %580 = vmatmul.bf16.vlgmr.msra.gmra.mxu3 %v496_v9 }
 0x130   :  { %v445_v10 = vpop.f32.mrf.mxu2 }
 0x131   :  { %v446_v11 = vadd.f32 %v847_v4, %v445_v10 }
 0x133   :  { %v482_v14 = vmax.f32 %v446_v11, 0.0 }
 0x138   :  { %v447_v12 = vpop.f32.mrf.mxu2 }
 0x139   :  { %v448_v13 = vadd.f32 %v847_v4, %v447_v12 }
 0x13b   :  { %v483_v15 = vmax.f32 %v448_v13, 0.0 }
 0x13d   :  { %v497_v16 = vpack.c.bf16 %v483_v15, %v482_v14 }
 0x13f   :  { %585 = vmatmul.bf16.gmra.mxu3 %v497_v16 }
 0x140   :  { %v450_v17 = vpop.f32.mrf.mxu2 }
 0x141   :  { %v451_v18 = vadd.f32 %v847_v4, %v450_v17 }
 0x143   :  { %v484_v21 = vmax.f32 %v451_v18, 0.0 }
 0x148   :  { %v452_v19 = vpop.f32.mrf.mxu2 }
 0x149   :  { %v453_v20 = vadd.f32 %v847_v4, %v452_v19 }
 0x14b   :  { %v485_v22 = vmax.f32 %v453_v20, 0.0 }
 0x14d   :  { %v498_v23 = vpack.c.bf16 %v485_v22, %v484_v21 }
 0x14f   :  { %590 = vmatmul.bf16.gmra.mxu3 %v498_v23 }
 0x150   :  { %v455_v24 = vpop.f32.mrf.mxu2 }
 0x151   :  { %v456_v25 = vadd.f32 %v847_v4, %v455_v24 }
 0x153   :  { %v486_v28 = vmax.f32 %v456_v25, 0.0 }
 0x158   :  { %v457_v26 = vpop.f32.mrf.mxu2 }
 0x159   :  { %v458_v27 = vadd.f32 %v847_v4, %v457_v26 }
 0x15b   :  { %v487_v29 = vmax.f32 %v458_v27, 0.0 }
 0x15d   :  { %v499_v30 = vpack.c.bf16 %v487_v29, %v486_v28 }
 0x15f   :  { %595 = vmatmul.bf16.gmra.mxu3 %v499_v30 }
 0x160   :  { %v460_v31 = vpop.f32.mrf.mxu2 }
 0x161   :  { %v461_v32 = vadd.f32 %v847_v4, %v460_v31 }
 0x163   :  { %v488_v35 = vmax.f32 %v461_v32, 0.0 }
 0x168   :  { %v462_v33 = vpop.f32.mrf.mxu2 }
 0x169   :  { %v463_v34 = vadd.f32 %v847_v4, %v462_v33 }
 0x16b   :  { %v489_v36 = vmax.f32 %v463_v34, 0.0 }
 0x16d   :  { %v500_v38 = vpack.c.bf16 %v489_v36, %v488_v35 }
 0x16f   :  { %600 = vmatmul.bf16.gmra.mxu3 %v500_v38 }
 0x170   :  { %v465_v39 = vpop.f32.mrf.mxu2 }
 0x171   :  { %v466_v40 = vadd.f32 %v847_v4, %v465_v39 }
 0x173   :  { %v490_v43 = vmax.f32 %v466_v40, 0.0 }
 0x178   :  { %v467_v41 = vpop.f32.mrf.mxu2 }
 0x179   :  { %v468_v42 = vadd.f32 %v847_v4, %v467_v41 }
 0x17b   :  { %v491_v44 = vmax.f32 %v468_v42, 0.0 }
 0x17d   :  { %v501_v45 = vpack.c.bf16 %v491_v44, %v490_v43 }
 0x17f   :  { %605 = vmatmul.bf16.gmra.mxu3 %v501_v45 }
 0x180   :  { %v470_v46 = vpop.f32.mrf.mxu2 }
 0x181   :  { %v471_v47 = vadd.f32 %v847_v4, %v470_v46 }
 0x183   :  { %v492_v50 = vmax.f32 %v471_v47, 0.0 }
 0x188   :  { %v472_v48 = vpop.f32.mrf.mxu2 }
 0x189   :  { %v473_v49 = vadd.f32 %v847_v4, %v472_v48 }
 0x18b   :  { %v493_v51 = vmax.f32 %v473_v49, 0.0 }
 0x18d   :  { %v502_v52 = vpack.c.bf16 %v493_v51, %v492_v50 }
 0x18f   :  { %610 = vmatmul.bf16.gmra.mxu3 %v502_v52 }
 0x190   :  { %v475_v53 = vpop.f32.mrf.mxu2 }
 0x191   :  { %v476_v54 = vadd.f32 %v847_v4, %v475_v53  ;;  %v645_v53 = vld [vmem:[%s1068_s9] sm:$0x1] }
 0x193   :  { %v494_v57 = vmax.f32 %v476_v54, 0.0 }
 0x198   :  { %v477_v55 = vpop.f32.mrf.mxu2 }
 0x199   :  { %v478_v56 = vadd.f32 %v847_v4, %v477_v55 }
 0x19b   :  { %v495_v58 = vmax.f32 %v478_v56, 0.0 }
 0x19d   :  { %v503_v59 = vpack.c.bf16 %v495_v58, %v494_v57 }
 0x19f   :  { %615 = vmatmul.bf16.gmra.mxu3 %v503_v59 }
 0x1b2   :  { %v581_v60 = vpop.f32.mrf.mxu3 }
 0x1b3   :  { %v582_v62 = vadd.f32 %v848_v61, %v581_v60 }
 0x1b5   :  { %v621_v1 = vmax.f32 %v582_v62, 0.0 }
 0x1ba   :  { %v583_v63 = vpop.f32.mrf.mxu3 }
 0x1bb   :  { %v584_v0 = vadd.f32 %v848_v61, %v583_v63 }
 0x1bd   :  { %v622_v2 = vmax.f32 %v584_v0, 0.0 }
 0x1bf   :  { %v637_v3 = vpack.c.bf16 %v622_v2, %v621_v1 }
 0x1c2   :  { %v586_v5 = vpop.f32.mrf.mxu3 }
 0x1c3   :  { %v587_v6 = vadd.f32 %v848_v61, %v586_v5 }
 0x1c5   :  { %v623_v4 = vmax.f32 %v587_v6, 0.0 }
 0x1ca   :  { %v588_v7 = vpop.f32.mrf.mxu3 }
 0x1cb   :  { %v589_v8 = vadd.f32 %v848_v61, %v588_v7 }
 0x1cd   :  { %v624_v37 = vmax.f32 %v589_v8, 0.0 }
 0x1cf   :  { %v638_v9 = vpack.c.bf16 %v624_v37, %v623_v4 }
 0x1d2   :  { %v591_v10 = vpop.f32.mrf.mxu3 }
 0x1d3   :  { %v592_v11 = vadd.f32 %v848_v61, %v591_v10 }
 0x1d5   :  { %v625_v14 = vmax.f32 %v592_v11, 0.0 }
 0x1da   :  { %v593_v12 = vpop.f32.mrf.mxu3 }
 0x1db   :  { %v594_v13 = vadd.f32 %v848_v61, %v593_v12 }
 0x1dd   :  { %v626_v15 = vmax.f32 %v594_v13, 0.0 }
 0x1df   :  { %v639_v16 = vpack.c.bf16 %v626_v15, %v625_v14 }
 0x1e2   :  { %v596_v17 = vpop.f32.mrf.mxu3 }
 0x1e3   :  { %v597_v18 = vadd.f32 %v848_v61, %v596_v17 }
 0x1e5   :  { %v627_v21 = vmax.f32 %v597_v18, 0.0 }
 0x1ea   :  { %v598_v19 = vpop.f32.mrf.mxu3 }
 0x1eb   :  { %v599_v20 = vadd.f32 %v848_v61, %v598_v19 }
 0x1ed   :  { %v628_v22 = vmax.f32 %v599_v20, 0.0 }
 0x1ef   :  { %v640_v23 = vpack.c.bf16 %v628_v22, %v627_v21 }
 0x1f2   :  { %v601_v24 = vpop.f32.mrf.mxu3 }
 0x1f3   :  { %v602_v25 = vadd.f32 %v848_v61, %v601_v24 }
 0x1f5   :  { %v629_v28 = vmax.f32 %v602_v25, 0.0 }
 0x1fa   :  { %v603_v26 = vpop.f32.mrf.mxu3 }
 0x1fb   :  { %v604_v27 = vadd.f32 %v848_v61, %v603_v26 }
 0x1fd   :  { %v630_v29 = vmax.f32 %v604_v27, 0.0 }
 0x1ff   :  { %v641_v30 = vpack.c.bf16 %v630_v29, %v629_v28 }
 0x202   :  { %v606_v31 = vpop.f32.mrf.mxu3 }
 0x203   :  { %v607_v49 = vadd.f32 %v848_v61, %v606_v31 }
 0x205   :  { %v631_v51 = vmax.f32 %v607_v49, 0.0 }
 0x20a   :  { %v608_v32 = vpop.f32.mrf.mxu3 }
 0x20b   :  { %v609_v47 = vadd.f32 %v848_v61, %v608_v32 }
 0x20d   :  { %v632_v50 = vmax.f32 %v609_v47, 0.0 }
 0x20f   :  { %v642_v52 = vpack.c.bf16 %v632_v50, %v631_v51 }
 0x212   :  { %v611_v33 = vpop.f32.mrf.mxu3 }
 0x213   :  { %v612_v44 = vadd.f32 %v848_v61, %v611_v33 }
 0x215   :  { %v633_v46 = vmax.f32 %v612_v44, 0.0 }
 0x21a   :  { %v613_v34 = vpop.f32.mrf.mxu3 }
 0x21b   :  { %v614_v42 = vadd.f32 %v848_v61, %v613_v34 }
 0x21d   :  { %v634_v45 = vmax.f32 %v614_v42, 0.0 }
 0x21f   :  { %v643_v48 = vpack.c.bf16 %v634_v45, %v633_v46 }
 0x222   :  { %v616_v35 = vpop.f32.mrf.mxu3 }
 0x223   :  { %v617_v36 = vadd.f32 %v848_v61, %v616_v35 }
 0x225   :  { %v635_v40 = vmax.f32 %v617_v36, 0.0 }
 0x22a   :  { %v618_v38 = vpop.f32.mrf.mxu3 }
 0x22b   :  { %v619_v39 = vadd.f32 %v848_v61, %v618_v38 }
 0x22d   :  { %v636_v41 = vmax.f32 %v619_v39, 0.0 }
 0x22f   :  { %v644_v43 = vpack.c.bf16 %v636_v41, %v635_v40 }
 0x231   :  { %646 = vmatpush.bf16.xpose.msrb.mxu0 %v644_v43 }
 0x239   :  { %647 = vmatpush.bf16.xpose.msrb.mxu0 %v643_v48 }
 0x241   :  { %648 = vmatpush.bf16.xpose.msrb.mxu0 %v642_v52 }
 0x249   :  { %649 = vmatpush.bf16.xpose.msrb.mxu0 %v641_v30 }
 0x251   :  { %650 = vmatpush.bf16.xpose.msrb.mxu0 %v640_v23 }
 0x259   :  { %651 = vmatpush.bf16.xpose.msrb.mxu0 %v639_v16 }
 0x261   :  { %652 = vmatpush.bf16.xpose.msrb.mxu0 %v638_v9 }
 0x269   :  { %653 = vmatpush.bf16.xpose.msrb.mxu0 %v637_v3 }
 0x270   :  { %654 = vmatmul.bf16.vlgmr.msrb.gmra.mxu0 %v645_v53 }
 0x2ed   :  { %v655_v54 = vpop.f32.mrf.mxu0 }
 0x2ee   :  { %659 = vst [vmem:[%s1069_s10] sm:$0x1] %v655_v54 }
 0x2f5   :  { %v657_v55 = vpop.f32.mrf.mxu0 }

</bundles_post_ra>
